<compile_context>
chip_gen: v6e
topology: v6e:2x2x1
jax: 0.10.0
libtpu: 0.0.40
codegen_flags: <defaults>
</compile_context>

<pallas_src>
import jax
import jax.numpy as jnp
from jax.experimental import pallas as pl
from jax.experimental.pallas import tpu as pltpu


def attention_kernel(eh_ref, enc_ref, we_ref, wo_ref, alpha_ref, ctx_ref):
    # eh_ref:   [Bt, dec]        precomputed hidden @ Wh^T + b_attn (per batch element)
    # enc_ref:  [L, Bt*enc2]     native time-major encoder slab (batch = lane chunks)
    # we_ref:   [enc2, dec]      encoder half of the attn weight, pre-transposed
    # wo_ref:   [1, dec]         out-layer weight row
    # alpha_ref:[Bt, L]          lane-dense attention weights
    # ctx_ref:  [Bt, enc2]       context vectors
    Bt, dec = eh_ref.shape
    L = alpha_ref.shape[1]
    enc2 = ctx_ref.shape[1]

    we = we_ref[...]            # [enc2, dec]
    wo = wo_ref[...]            # [1, dec]

    # Pass 1: per-batch energy + raw scores (MXU), statically unrolled over the tile.
    score_rows = []
    for bi in range(Bt):
        enc_b = enc_ref[:, pl.ds(bi * enc2, enc2)]          # [L, enc2]  static lane slice
        eh_b = eh_ref[pl.ds(bi, 1), :]                      # [1, dec]

        # energy = tanh(enc @ We^T + (hidden @ Wh^T + b_attn))     (MXU + VPU/EUP)
        energy = jnp.tanh(
            jnp.dot(enc_b, we, preferred_element_type=jnp.float32) + eh_b)   # [L, dec]

        # scores = w_out @ energy^T   (MXU, A @ B^T form) -> [1, L]
        # b_out omitted: softmax is shift-invariant, so it cannot change alpha/context.
        score_rows.append(jax.lax.dot_general(
            wo, energy, (((1,), (1,)), ((), ())),
            preferred_element_type=jnp.float32))             # [1, L]

    scores = jnp.concatenate(score_rows, axis=0) if Bt > 1 else score_rows[0]  # [Bt, L]

    # Softmax over the source-length (lane) axis, vectorized across the batch tile.
    m = jnp.max(scores, axis=-1, keepdims=True)              # [Bt, 1]
    e = jnp.exp(scores - m)                                  # [Bt, L]   (EUP)
    s = jnp.sum(e, axis=-1, keepdims=True)                   # [Bt, 1]   (XLU)
    inv = pl.reciprocal(s, approx=True)                      # EUP
    inv = inv * (2.0 - s * inv)                              # one Newton step -> ~f32 accurate
    alpha_ref[...] = e * inv                                 # single lane-dense store

    # Pass 2: context = alpha @ enc per batch element (MXU) -> [1, enc2]
    for bi in range(Bt):
        enc_b = enc_ref[:, pl.ds(bi * enc2, enc2)]           # [L, enc2]
        a_b = alpha_ref[pl.ds(bi, 1), :]                     # [1, L]
        ctx_ref[pl.ds(bi, 1), :] = jnp.dot(
            a_b, enc_b, preferred_element_type=jnp.float32)


def attention_forward(hidden, encoder_outputs, W_attn, b_attn, w_out, b_out):
    """hidden: [1, B, dec], encoder_outputs: [L, B, enc2]  (PyTorch layout)."""
    L, B, enc2 = encoder_outputs.shape
    dec = hidden.shape[2]
    # b_out is intentionally unused: adding a constant to every score is a no-op for
    # softmax and hence for both returned values.
    del b_out

    # Hoisted hidden projection: one small XLA matmul instead of B re-issued M=1 MXU
    # matmuls inside the kernel. Folds b_attn in as well.
    eh = hidden[0] @ W_attn[:, :dec].T + b_attn              # [B, dec]
    we = W_attn[:, dec:].T                                   # [enc2, dec]
    wo = w_out.reshape(1, dec)                               # [1, dec]

    # Free (metadata-only) reshape of the native [L, B, enc2] layout: each batch element
    # becomes a contiguous enc2-wide lane chunk. No transpose, no extra HBM pass.
    enc_flat = encoder_outputs.reshape(L, B * enc2)

    # Batch tile: whole batch when small; 8-aligned tiles when the batch is large and
    # the lane width stays 128-aligned.
    if B <= 8:
        Bt = B
    elif B % 8 == 0 and (8 * enc2) % 128 == 0:
        Bt = 8
    else:
        Bt = B
    num_tiles = B // Bt

    alpha, ctx = pl.pallas_call(
        attention_kernel,
        out_shape=(jax.ShapeDtypeStruct((B, L), jnp.float32),
                   jax.ShapeDtypeStruct((B, enc2), jnp.float32)),
        grid=(num_tiles,),
        in_specs=[
            pl.BlockSpec((Bt, dec), lambda b: (b, 0)),        # eh (per batch tile)
            pl.BlockSpec((L, Bt * enc2), lambda b: (0, b)),   # enc, native layout
            pl.BlockSpec((enc2, dec), lambda b: (0, 0)),      # We^T (constant block)
            pl.BlockSpec((1, dec), lambda b: (0, 0)),         # w_out (constant block)
        ],
        out_specs=(
            pl.BlockSpec((Bt, L), lambda b: (b, 0)),          # alpha, lane-dense [B, L]
            pl.BlockSpec((Bt, enc2), lambda b: (b, 0)),       # context [B, enc2]
        ),
        compiler_params=pltpu.CompilerParams(dimension_semantics=("parallel",)),
    )(eh.astype(jnp.float32), enc_flat.astype(jnp.float32),
      we.astype(jnp.float32), wo.astype(jnp.float32))

    context = ctx[None, :, :]                                 # [1, B, enc2]  ('b o h -> o b h')
    return alpha, context


def attention_reference(hidden, encoder_outputs, W_attn, b_attn, w_out, b_out):
    """Pure-JAX reference mirroring the PyTorch forward exactly (including b_out)."""
    L, B, enc2 = encoder_outputs.shape
    dec = hidden.shape[2]
    h = jnp.broadcast_to(jnp.transpose(hidden, (1, 0, 2)), (B, L, dec))
    enc = jnp.transpose(encoder_outputs, (1, 0, 2))
    cat = jnp.concatenate([h, enc], axis=2)
    energy = jnp.tanh(cat @ W_attn.T + b_attn)
    attn = (energy @ w_out.T + b_out)[:, :, 0]
    alpha = jax.nn.softmax(attn, axis=1)
    ctx = jnp.matmul(alpha[:, None, :], enc)                  # [B, 1, enc2]
    return alpha, jnp.transpose(ctx, (1, 0, 2))               # [1, B, enc2]


if __name__ == "__main__":
    enc_hidden_dim = 16
    dec_hidden_dim = 32
    B, L = 2, 8
    enc2 = 2 * enc_hidden_dim
    in_dim = enc2 + dec_hidden_dim

    key = jax.random.PRNGKey(0)
    k1, k2, k3, k4, k5, k6 = jax.random.split(key, 6)

    # Deterministic parameter init (shapes match nn.Linear weights/biases).
    W_attn = 0.1 * jax.random.normal(k1, (dec_hidden_dim, in_dim), jnp.float32)
    b_attn = 0.1 * jax.random.normal(k2, (dec_hidden_dim,), jnp.float32)
    w_out = 0.1 * jax.random.normal(k3, (1, dec_hidden_dim), jnp.float32)
    b_out = 0.1 * jax.random.normal(k4, (1,), jnp.float32)

    # Example inputs (PyTorch layout).
    hidden = jax.random.normal(k5, (1, B, dec_hidden_dim), jnp.float32)
    encoder_outputs = jax.random.normal(k6, (L, B, enc2), jnp.float32)

    alpha, context = attention_forward(hidden, encoder_outputs, W_attn, b_attn, w_out, b_out)
    alpha = jax.block_until_ready(alpha)
    context = jax.block_until_ready(context)

    alpha_ref, context_ref = attention_reference(hidden, encoder_outputs,
                                                 W_attn, b_attn, w_out, b_out)
    assert alpha.shape == (B, L) and context.shape == (1, B, enc2)
    assert jnp.allclose(alpha, alpha_ref, atol=1e-5, rtol=1e-5)
    assert jnp.allclose(context, context_ref, atol=1e-5, rtol=1e-5)

    print("KERNEL_OK")
</pallas_src>

<mosaic_0001>
module attributes {stable_mosaic.version = 11 : i64} {
  func.func @attention_kernel(%arg0: i32, %arg1: memref<2x32xf32, #tpu.memory_space<vmem>>, %arg2: memref<8x64xf32, #tpu.memory_space<vmem>>, %arg3: memref<32x32xf32, #tpu.memory_space<vmem>>, %arg4: memref<1x32xf32, #tpu.memory_space<vmem>>, %arg5: memref<2x8xf32, #tpu.memory_space<vmem>>, %arg6: memref<2x32xf32, #tpu.memory_space<vmem>>) attributes {dimension_semantics = [#tpu.dimension_semantics<parallel>], iteration_bounds = array<i64: 1>, scalar_prefetch = 0 : i64, scratch_operands = 0 : i64, tpu.core_type = #tpu.core_type<tc>, window_params = [{transform_indices = @transform_0, window_bounds = array<i64: 2, 32>}, {transform_indices = @transform_1, window_bounds = array<i64: 8, 64>}, {pipeline_mode = #tpu.pipeline_mode<synchronous>, transform_indices = @transform_2, window_bounds = array<i64: 32, 32>}, {pipeline_mode = #tpu.pipeline_mode<synchronous>, transform_indices = @transform_3, window_bounds = array<i64: 1, 32>}, {transform_indices = @transform_4, window_bounds = array<i64: 2, 8>}, {transform_indices = @transform_5, window_bounds = array<i64: 2, 32>}]} {
    %c0 = arith.constant 0 : index
    %c0_0 = arith.constant 0 : index
    %0 = vector.load %arg3[%c0, %c0_0] : memref<32x32xf32, #tpu.memory_space<vmem>>, vector<32x32xf32>
    %c0_1 = arith.constant 0 : index
    %c0_2 = arith.constant 0 : index
    %1 = vector.load %arg4[%c0_1, %c0_2] : memref<1x32xf32, #tpu.memory_space<vmem>>, vector<1x32xf32>
    %c0_3 = arith.constant 0 : index
    %c0_4 = arith.constant 0 : index
    %2 = vector.load %arg2[%c0_3, %c0_4] : memref<8x64xf32, #tpu.memory_space<vmem>>, vector<8x32xf32>
    %c0_5 = arith.constant 0 : index
    %c0_6 = arith.constant 0 : index
    %3 = vector.load %arg1[%c0_5, %c0_6] : memref<2x32xf32, #tpu.memory_space<vmem>>, vector<1x32xf32>
    %cst = arith.constant dense<0.000000e+00> : vector<8x32xf32>
    %4 = tpu.matmul %2, %0, %cst {dimension_numbers = #tpu.dot_dimension_numbers<[1], [0], [0], [1], [0, 0, 1, 1], [], []>} : vector<8x32xf32>, vector<32x32xf32>, vector<8x32xf32> -> vector<8x32xf32>
    %5 = vector.broadcast %3 : vector<1x32xf32> to vector<8x32xf32>
    %6 = arith.addf %4, %5 : vector<8x32xf32>
    %7 = math.tanh %6 : vector<8x32xf32>
    %cst_7 = arith.constant dense<0.000000e+00> : vector<1x8xf32>
    %8 = tpu.matmul %1, %7, %cst_7 {dimension_numbers = #tpu.dot_dimension_numbers<[1], [1], [0], [0], [0, 0, 1, 0], [], []>} : vector<1x32xf32>, vector<8x32xf32>, vector<1x8xf32> -> vector<1x8xf32>
    %c0_8 = arith.constant 0 : index
    %c32 = arith.constant 32 : index
    %9 = vector.load %arg2[%c0_8, %c32] : memref<8x64xf32, #tpu.memory_space<vmem>>, vector<8x32xf32>
    %c1 = arith.constant 1 : index
    %c0_9 = arith.constant 0 : index
    %10 = vector.load %arg1[%c1, %c0_9] : memref<2x32xf32, #tpu.memory_space<vmem>>, vector<1x32xf32>
    %cst_10 = arith.constant dense<0.000000e+00> : vector<8x32xf32>
    %11 = tpu.matmul %9, %0, %cst_10 {dimension_numbers = #tpu.dot_dimension_numbers<[1], [0], [0], [1], [0, 0, 1, 1], [], []>} : vector<8x32xf32>, vector<32x32xf32>, vector<8x32xf32> -> vector<8x32xf32>
    %12 = vector.broadcast %10 : vector<1x32xf32> to vector<8x32xf32>
    %13 = arith.addf %11, %12 : vector<8x32xf32>
    %14 = math.tanh %13 : vector<8x32xf32>
    %cst_11 = arith.constant dense<0.000000e+00> : vector<1x8xf32>
    %15 = tpu.matmul %1, %14, %cst_11 {dimension_numbers = #tpu.dot_dimension_numbers<[1], [1], [0], [0], [0, 0, 1, 0], [], []>} : vector<1x32xf32>, vector<8x32xf32>, vector<1x8xf32> -> vector<1x8xf32>
    %16 = tpu.concatenate %8, %15 in 0 : vector<1x8xf32>, vector<1x8xf32> -> vector<2x8xf32>
    %cst_12 = arith.constant dense<0xFF800000> : vector<2xf32>
    %17 = vector.multi_reduction <maximumf>, %16, %cst_12 [1] : vector<2x8xf32> to vector<2xf32>
    %18 = vector.shape_cast %17 : vector<2xf32> to vector<2x1xf32>
    %19 = vector.broadcast %18 : vector<2x1xf32> to vector<2x8xf32>
    %20 = arith.subf %16, %19 : vector<2x8xf32>
    %21 = math.exp %20 : vector<2x8xf32>
    %cst_13 = arith.constant dense<0.000000e+00> : vector<2xf32>
    %22 = vector.multi_reduction <add>, %21, %cst_13 [1] : vector<2x8xf32> to vector<2xf32>
    %23 = vector.shape_cast %22 : vector<2xf32> to vector<2x1xf32>
    %24 = tpu.reciprocal %23 {approx = true} : vector<2x1xf32> -> vector<2x1xf32>
    %25 = arith.mulf %23, %24 : vector<2x1xf32>
    %cst_14 = arith.constant 2.000000e+00 : f32
    %26 = vector.broadcast %cst_14 : f32 to vector<2x1xf32>
    %27 = arith.subf %26, %25 : vector<2x1xf32>
    %28 = arith.mulf %24, %27 : vector<2x1xf32>
    %29 = vector.broadcast %28 : vector<2x1xf32> to vector<2x8xf32>
    %30 = arith.mulf %21, %29 : vector<2x8xf32>
    %c0_15 = arith.constant 0 : index
    %c0_16 = arith.constant 0 : index
    %31 = vector.load %arg5[%c0_15, %c0_16] : memref<2x8xf32, #tpu.memory_space<vmem>>, vector<2x8xf32>
    tpu.vector_store %arg5[%c0_15, %c0_16], %30 {strides = array<i32>} : memref<2x8xf32, #tpu.memory_space<vmem>>, vector<2x8xf32>,
    %c0_17 = arith.constant 0 : index
    %c0_18 = arith.constant 0 : index
    %32 = vector.load %arg2[%c0_17, %c0_18] : memref<8x64xf32, #tpu.memory_space<vmem>>, vector<8x32xf32>
    %c0_19 = arith.constant 0 : index
    %c0_20 = arith.constant 0 : index
    %33 = vector.load %arg5[%c0_19, %c0_20] : memref<2x8xf32, #tpu.memory_space<vmem>>, vector<1x8xf32>
    %cst_21 = arith.constant dense<0.000000e+00> : vector<1x32xf32>
    %34 = tpu.matmul %33, %32, %cst_21 {dimension_numbers = #tpu.dot_dimension_numbers<[1], [0], [0], [1], [0, 0, 1, 1], [], []>} : vector<1x8xf32>, vector<8x32xf32>, vector<1x32xf32> -> vector<1x32xf32>
    %c0_22 = arith.constant 0 : index
    %c0_23 = arith.constant 0 : index
    %35 = vector.load %arg6[%c0_22, %c0_23] : memref<2x32xf32, #tpu.memory_space<vmem>>, vector<1x32xf32>
    tpu.vector_store %arg6[%c0_22, %c0_23], %34 {strides = array<i32>} : memref<2x32xf32, #tpu.memory_space<vmem>>, vector<1x32xf32>,
    %c0_24 = arith.constant 0 : index
    %c32_25 = arith.constant 32 : index
    %36 = vector.load %arg2[%c0_24, %c32_25] : memref<8x64xf32, #tpu.memory_space<vmem>>, vector<8x32xf32>
    %c1_26 = arith.constant 1 : index
    %c0_27 = arith.constant 0 : index
    %37 = vector.load %arg5[%c1_26, %c0_27] : memref<2x8xf32, #tpu.memory_space<vmem>>, vector<1x8xf32>
    %cst_28 = arith.constant dense<0.000000e+00> : vector<1x32xf32>
    %38 = tpu.matmul %37, %36, %cst_28 {dimension_numbers = #tpu.dot_dimension_numbers<[1], [0], [0], [1], [0, 0, 1, 1], [], []>} : vector<1x8xf32>, vector<8x32xf32>, vector<1x32xf32> -> vector<1x32xf32>
    %c1_29 = arith.constant 1 : index
    %c0_30 = arith.constant 0 : index
    %39 = vector.load %arg6[%c1_29, %c0_30] : memref<2x32xf32, #tpu.memory_space<vmem>>, vector<1x32xf32>
    tpu.vector_store %arg6[%c1_29, %c0_30], %38 {strides = array<i32>} : memref<2x32xf32, #tpu.memory_space<vmem>>, vector<1x32xf32>,
    return
  }
  func.func @transform_0(%arg0: i32) -> (i32, i32) {
    %c0_i32 = arith.constant 0 : i32
    %c0_i32_0 = arith.constant 0 : i32
    return %arg0, %c0_i32 : i32, i32
  }
  func.func @transform_1(%arg0: i32) -> (i32, i32) {
    %c0_i32 = arith.constant 0 : i32
    %c0_i32_0 = arith.constant 0 : i32
    return %c0_i32, %arg0 : i32, i32
  }
  func.func @transform_2(%arg0: i32) -> (i32, i32) {
    %c0_i32 = arith.constant 0 : i32
    %c0_i32_0 = arith.constant 0 : i32
    %c0_i32_1 = arith.constant 0 : i32
    return %c0_i32, %c0_i32_0 : i32, i32
  }
  func.func @transform_3(%arg0: i32) -> (i32, i32) {
    %c0_i32 = arith.constant 0 : i32
    %c0_i32_0 = arith.constant 0 : i32
    %c0_i32_1 = arith.constant 0 : i32
    return %c0_i32, %c0_i32_0 : i32, i32
  }
  func.func @transform_4(%arg0: i32) -> (i32, i32) {
    %c0_i32 = arith.constant 0 : i32
    %c0_i32_0 = arith.constant 0 : i32
    return %arg0, %c0_i32 : i32, i32
  }
  func.func @transform_5(%arg0: i32) -> (i32, i32) {
    %c0_i32 = arith.constant 0 : i32
    %c0_i32_0 = arith.constant 0 : i32
    return %arg0, %c0_i32 : i32, i32
  }
}

</mosaic_0001>

<bundles_post_ra>
// kernel: tpu_custom_call.1
= control target key start
LH: loop header
LB: loop body
LE: loop exit
PB: predicated region body
PF: predicated region fallthrough
CT: control target
= control target key end

     0   :  { %11 = vsyncpa [#allocation3], 0  ;;  %s859_s0 = inlined_call_operand.hbm [shape: f32[2,32], index: 0, kind: input, shape index: {}]   ;;  %s860_s1 = inlined_call_operand.hbm [shape: f32[8,64], index: 1, kind: input, shape index: {}]   ;;  %s861_s2 = inlined_call_operand.hbm [shape: f32[32,32], index: 2, kind: input, shape index: {}]   ;;  %s862_s3 = inlined_call_operand.vmem [shape: f32[1,32], index: 3, kind: input, shape index: {}]   ;;  %s863_s4 = inlined_call_operand.hbm [shape: f32[2,8], index: 4, kind: output, shape index: {0}]   ;;  %s864_s5 = inlined_call_operand.hbm [shape: f32[2,32], index: 5, kind: output, shape index: {1}]  }
   0x1   :  { %12 = vsyncpa [#allocation6], 0 }
   0x2   :  { %13 = vsyncpa [#allocation4], 0 }
   0x3   :  { %14 = vsyncpa [#allocation10], 0  ;;  %s778_s18 = smov [#allocation5]   ;;  %s779_s20 = smov [#allocation2]  }
   0x4   :  { %s31_s19 = sshll.u32 %s778_s18, 4  ;;  %s21_s21 = sshll.u32 %s779_s20, 4  ;;  %s32_s19 = int_to_ptr.vmem [resolvable:$true] %s31_s19  ;;  %s22_s21 = int_to_ptr.vmem [resolvable:$true] %s21_s21 }
   0x5   :  { %s678_s22 = scalar_lea.vmem %s32_s19, 128  ;;  %p683_p1 = scmp.lt.s32.totalorder %s32_s19, %s32_s19 }
   0x6   :  { %p679_p0 = scmp.ne.s32.totalorder %s32_s19, %s678_s22  ;;  %p684_p2 = scmp.lt.s32.totalorder %s678_s22, %s678_s22 }
   0x8   :  { %p685_p3 = por %p684_p2, %p683_p1 }
   0xa   :  { %p686_p4 = pnand %p685_p3, %p679_p0 }
   0xc   :  { %689 = shalt.err (!%p686_p4)
}
   0xd   :  { %34 = dma.hbm_to_vmem [thread:$0]  %s860_s1, 128, %s32_s19, [#allocation6]  }
   0xe   :  { %s698_s25 = scalar_lea.vmem %s22_s21, 32  ;;  %p703_p6 = scmp.lt.s32.totalorder %s22_s21, %s22_s21 }
   0xf   :  { %p699_p5 = scmp.ne.s32.totalorder %s22_s21, %s698_s25  ;;  %p704_p7 = scmp.lt.s32.totalorder %s698_s25, %s698_s25 }
  0x11   :  { %p705_p8 = por %p704_p7, %p703_p6 }
  0x13   :  { %p706_p9 = pnand %p705_p8, %p699_p5 }
  0x15   :  { %709 = shalt.err (!%p706_p9)
}
  0x16   :  { %24 = dma.hbm_to_vmem [thread:$0]  %s859_s0, 32, %s22_s21, [#allocation3]  }
  0x17   :  { %s780_s28 = smov [#allocation7]  }
  0x18   :  { %s40_s29 = sshll.u32 %s780_s28, 4  ;;  %s41_s29 = int_to_ptr.vmem [resolvable:$true] %s40_s29 }
  0x19   :  { %s718_s30 = scalar_lea.vmem %s41_s29, 512  ;;  %p723_p11 = scmp.lt.s32.totalorder %s41_s29, %s41_s29 }
  0x1a   :  { %p719_p10 = scmp.ne.s32.totalorder %s41_s29, %s718_s30  ;;  %p724_p12 = scmp.lt.s32.totalorder %s718_s30, %s718_s30 }
  0x1c   :  { %p725_p13 = por %p724_p12, %p723_p11 }
  0x1e   :  { %p726_p0 = pnand %p725_p13, %p719_p10 }
  0x20   :  { %729 = shalt.err (!%p726_p0)
}
  0x21   :  { %s781_s1 = smov 128   ;;  %s782_s6 = smov 8  }
  0x22   :  { %46 = dma.hbm_to_vmem [thread:$0]  %s861_s2, 512, %s41_s29, [#allocation6], %s781_s1, %s781_s1, %s782_s6  }
  0x23   :  { %770 = dma.done.wait [#allocation3], 32  }
  0x24   :  { %771 = vsyncadd [#allocation3], 4294967264 }
  0x25   :  { %772 = dma.done.wait [#allocation6], 640  }
  0x26   :  { %773 = vsyncadd [#allocation6], 4294966656  ;;  %v783_v0 = vmov 0.0   ;;  %vm784_vm0 = vmmov 0   ;;  %v61_v1 = vld [vmem:[#allocation7 + $0x18] sm:$0xff]  ;;  %v60_v2 = vld [vmem:[#allocation7 + $0x10] sm:$0xff] }
  0x27   :  { %610 = vmatprep.subr.mxu0 %v783_v0  ;;  %618 = vmatprep.mubr.msk.f32.mxu0 %vm784_vm0, %v783_v0  ;;  %v829_v3 = vld [vmem:[#allocation5] sm:$0xff]  ;;  %v59_v4 = vld [vmem:[#allocation7 + $0x8] sm:$0xff]  ;;  %s785_s0 = smov 96   ;;  %v58_v5 = vld [vmem:[#allocation7] sm:$0xff]  ;;  %vm69_vm1 = vcmask 261120   ;;  %vm376_vm2 = vcmask 1040384  }
  0x28   :  { %621 = vmatprep.subr.mxu1 %v783_v0  ;;  %623 = vmatprep.mubr.msk.f32.mxu1 %vm784_vm0, %v783_v0  ;;  %v582_v6 = vld [vmem:[#allocation2] ss:$0 sm:$0xff]  ;;  %v586_v15 = vld [vmem:[#allocation2 + $0x1] ss:$0 sm:$0xff]  ;;  %vm378_vm3 = vcmask 58368   ;;  %vm396_vm4 = vcmask 64512  }
  0x29   :  { %611 = vmatpush3.msra.mxu0 %v61_v1  ;;  %225 = vrot.lane.b32.xlu0 %v829_v3, %s785_s0  ;;  %v62_v11 = vld [vmem:[%s862_s3] sm:$0x1]  ;;  %s786_s3 = smov [#allocation8]  }
  0x2a   :  { %612 = vmatprep.subr.mxu0 %v783_v0  ;;  %s558_s10 = sshll.u32 %s786_s3, 4  ;;  %s559_s10 = int_to_ptr.vmem [resolvable:$true] %s558_s10 }
  0x2b   :  { %613 = vmatpush3.msra.mxu0 %v60_v2  ;;  %s730_s11 = scalar_lea.vmem %s559_s10, 32  ;;  %p735_p2 = scmp.lt.s32.totalorder %s559_s10, %s559_s10 }
  0x2c   :  { %614 = vmatprep.subr.mxu0 %v783_v0  ;;  %p731_p1 = scmp.ne.s32.totalorder %s559_s10, %s730_s11  ;;  %p736_p3 = scmp.lt.s32.totalorder %s730_s11, %s730_s11 }
  0x2d   :  { %615 = vmatpush3.msra.mxu0 %v59_v4 }
  0x2e   :  { %616 = vmatprep.subr.mxu0 %v783_v0  ;;  %p737_p4 = por %p736_p3, %p735_p2 }
  0x2f   :  { %617 = vmatpush3.msra.mxu0 %v58_v5 }
  0x30   :  { %619 = vmatmul.mubr.msk.f32.vlgmr.msra.gmra.mxu0 %vm69_vm1, %v829_v3  ;;  %637 = vmatprep.subr.mxu0 %v783_v0  ;;  %p738_p5 = pnand %p737_p4, %p731_p1 }
  0x31   :  { %639 = vmatprep.mubr.msk.f32.mxu0 %vm784_vm0, %v783_v0 }
  0x9b   :  { %v226_v12 = vpop.permute.xlu0 %225 }
  0xf0   :  { %v139_v7 = vpop.f32.mrf.mxu0 }
  0xf1   :  { %v140_v8 = vadd.f32 %v582_v6, %v139_v7 }
  0xf2   :  { %v620_v9 = vpop.f32.mrf.mxu0 }
  0xf3   :  { %662 = vtanh.f32 %v140_v8 }
 0x100   :  { %v663_v10 = vpop.eup %662 }
 0x101   :  { %622 = vmatpush3.xpose.msk.msra.mxu1 %vm69_vm1, %v663_v10 }
 0x102   :  { %626 = vmatprep.subr.mxu1 %v783_v0 }
 0x104   :  { %624 = vmatmul.mubr.msk.f32.vlgmr.msra.gmra.mxu1 %vm69_vm1, %v62_v11 }
 0x105   :  { %627 = vmatpush3.msra.mxu1 %v61_v1  ;;  %634 = vmatprep.mubr.msk.f32.mxu1 %vm784_vm0, %v783_v0 }
 0x106   :  { %628 = vmatprep.subr.mxu1 %v783_v0 }
 0x107   :  { %629 = vmatpush3.msra.mxu1 %v60_v2 }
 0x108   :  { %630 = vmatprep.subr.mxu1 %v783_v0 }
 0x109   :  { %631 = vmatpush3.msra.mxu1 %v59_v4 }
 0x10a   :  { %632 = vmatprep.subr.mxu1 %v783_v0 }
 0x10b   :  { %633 = vmatpush3.msra.mxu1 %v58_v5 }
 0x10c   :  { %635 = vmatmul.mubr.msk.f32.vlgmr.msra.gmra.mxu1 %vm69_vm1, %v226_v12  ;;  %647 = vmatprep.subr.mxu1 %v783_v0 }
 0x10d   :  { %649 = vmatprep.mubr.msk.f32.mxu1 %vm784_vm0, %v783_v0 }
 0x1c4   :  { %v216_v13 = vpop.f32.mrf.mxu1 }
 0x1c6   :  { %v625_v14 = vpop.f32.mrf.mxu1 }
 0x1cc   :  { %v295_v16 = vpop.f32.mrf.mxu1 }
 0x1cd   :  { %v296_v17 = vadd.f32 %v586_v15, %v295_v16 }
 0x1ce   :  { %v636_v18 = vpop.f32.mrf.mxu1 }
 0x1cf   :  { %664 = vtanh.f32 %v296_v17 }
 0x1dc   :  { %v665_v19 = vpop.eup %664 }
 0x1dd   :  { %638 = vmatpush3.xpose.msk.msra.mxu0 %vm69_vm1, %v665_v19 }
 0x1de   :  { %642 = vmatprep.subr.mxu0 %v783_v0 }
 0x1e0   :  { %640 = vmatmul.mubr.msk.f32.vlgmr.msra.gmra.mxu0 %vm69_vm1, %v62_v11 }
 0x1e1   :  { %643 = vmatpush3.msra.mxu0 %v829_v3  ;;  %644 = vmatprep.mubr.msk.f32.mxu0 %vm784_vm0, %v783_v0 }
 0x2a0   :  { %v369_v20 = vpop.f32.mrf.mxu0 }
 0x2a1   :  { %v374_v21 = vrot.slane %v369_v20, 7 }
 0x2a2   :  { %v641_v22 = vpop.f32.mrf.mxu0 }
 0x2a3   :  { %v377_v23 = vsel %vm376_vm2, %v216_v13, %v374_v21 }
 0x2a4   :  { %v379_v24 = vsel %vm378_vm3, %v377_v23, -inf }
 0x2a5   :  { %380 = vmax.xlane.f32.xlu0 %v379_v24 }
 0x32e   :  { %v381_v25 = vpop.xlane.xlu0 %380 }
 0x32f   :  { %v382_v26 = vsub.f32 %v377_v23, %v381_v25 }
 0x331   :  { %v383_v27 = vmul.f32 1.442695, %v382_v26 }
 0x333   :  { %666 = vpow2.f32 %v383_v27 }
 0x340   :  { %v667_v28 = vpop.eup %666 }
 0x341   :  { %v385_v29 = vsel %vm378_vm3, %v667_v28, 0.0 }
 0x342   :  { %386 = vadd.xlane.f32.xlu1 %v385_v29 }
 0x353   :  { %475 = vrot.lane.b32.xlu1 %v829_v3, %s785_s0 }
 0x3cb   :  { %v387_v30 = vpop.xlane.xlu1 %386 }
 0x3cc   :  { %668 = vrcp.f32 %v387_v30 }
 0x3cf   :  { %v476_v31 = vpop.permute.xlu1 %475 }
 0x3d0   :  { %648 = vmatpush3.msra.mxu1 %v476_v31 }
 0x3d9   :  { %v669_v32 = vpop.eup %668 }
 0x3da   :  { %v389_v33 = vmul.f32 %v669_v32, %v387_v30 }
 0x3dc   :  { %v390_v34 = vsub.f32 2.0, %v389_v33 }
 0x3de   :  { %v391_v35 = vmul.f32 %v669_v32, %v390_v34 }
 0x3e0   :  { %v392_v36 = vmul.f32 %v667_v28, %v391_v35 }
 0x3e2   :  { %393 = vst.msk [vmem:[#allocation8] sm:$0x3] %vm378_vm3, %v392_v36 }
 0x3e9   :  { %v395_v37 = vld [vmem:[#allocation8] sm:$0x1]  ;;  %v473_v38 = vld [vmem:[#allocation8 + $0x1] sm:$0x1] }
 0x3ea   :  { %645 = vmatmul.mubr.msk.f32.vlgmr.msra.gmra.mxu0 %vm396_vm4, %v395_v37  ;;  %650 = vmatmul.mubr.msk.f32.vlgmr.msra.gmra.mxu1 %vm396_vm4, %v473_v38 }
 0x3eb   :  { %741 = shalt.err (!%p738_p5)
}
 0x3ec   :  { %561 = dma.vmem_to_hbm [thread:$0]  %s559_s10, 32, %s863_s4, [#allocation4]   ;;  %vm470_vm5 = vcmask 253952  }
 0x3ed   :  { %s787_s14 = smov [#allocation9]  }
 0x3ee   :  { %s568_s15 = sshll.u32 %s787_s14, 4  ;;  %s569_s15 = int_to_ptr.vmem [resolvable:$true] %s568_s15 }
 0x3ef   :  { %s750_s16 = scalar_lea.vmem %s569_s15, 32  ;;  %p755_p7 = scmp.lt.s32.totalorder %s569_s15, %s569_s15 }
 0x3f0   :  { %p751_p6 = scmp.ne.s32.totalorder %s569_s15, %s750_s16  ;;  %p756_p8 = scmp.lt.s32.totalorder %s750_s16, %s750_s16 }
 0x3f2   :  { %p757_p9 = por %p756_p8, %p755_p7 }
 0x3f4   :  { %p758_p10 = pnand %p757_p9, %p751_p6 }
 0x4aa   :  { %v466_v39 = vpop.f32.mrf.mxu0  ;;  %v547_v40 = vpop.f32.mrf.mxu1 }
 0x4ab   :  { %471 = vst.msk [vmem:[#allocation9] sm:$0x1] %vm470_vm5, %v466_v39  ;;  %551 = vst.msk [vmem:[#allocation9 + $0x1] sm:$0x1] %vm470_vm5, %v547_v40 }
 0x4ac   :  { %v646_v41 = vpop.f32.mrf.mxu0  ;;  %v651_v42 = vpop.f32.mrf.mxu1 }
 0x4ad   :  { %761 = shalt.err (!%p758_p10)
}
 0x4ae   :  { %571 = dma.vmem_to_hbm [thread:$0]  %s569_s15, 32, %s864_s5, [#allocation10]  }
 0x4af   :  { %774 = dma.done.wait [#allocation4], 32  }
 0x4b0   :  { %775 = vsyncadd [#allocation4], 4294967264 }
 0x4b1   :  { %776 = dma.done.wait [#allocation10], 32  }
 0x4b2   :  { %777 = vsyncadd [#allocation10], 4294967264 }
 0x4b3   :  { %578 = vsyncpa [#allocation3], 1 }
 0x4b4   :  { %579 = vsyncpa [#allocation6], 1 }
 0x4b5   :  { %580 = vsyncpa [#allocation4], 1 }
 0x4b6   :  { %581 = vsyncpa [#allocation10], 1 }

</bundles_post_ra>
